<compile_context>
chip_gen: v7x
topology: tpu7x:2x2x1
jax: 0.10.0
libtpu: 0.0.40
codegen_flags: <defaults>
</compile_context>

<pallas_src>
import math
from functools import partial

import jax
import jax.numpy as jnp
from jax.experimental import pallas as pl
from jax.experimental.pallas import tpu as pltpu


def _patch_expand_kernel(x_ref, w_ref, avg_ref, g_ref, b_ref, o_ref, *, W, c, eps):
    """Fused expand matmul + segmented LayerNorm + pixel-shuffle store.

    x_ref  : (tm, dim)       tm = tr*W tokens (whole (b,h) rows), dim = 2*c
    w_ref  : (dim, 4c)       expand weight (torch expand.weight.T), columns ordered (p1,p2,c)
    avg_ref: (4c, 4c)        block-diagonal chunk-averaging matrix (1/c within each c-chunk)
    g_ref  : (1, 4c)         LayerNorm gamma tiled over the 4 (p1,p2) chunks
    b_ref  : (1, 4c)         LayerNorm beta  tiled
    o_ref  : (tr, 2, W, 2c)  output block; row-major == ((b,h), p1, w, (p2,c))
    """
    # Expand projection on the MXU in the operands' native dtype, f32 accumulation.
    y = jnp.dot(x_ref[...], w_ref[...], preferred_element_type=jnp.float32)      # (tm, 4c)

    # Segmented LayerNorm statistics on the MXU: the block-diagonal averaging matmul yields
    # the per-chunk mean (and E[d^2]) already broadcast across each c-wide column chunk.
    avg = avg_ref[...]                                                            # (4c, 4c) f32
    mu = jnp.dot(y, avg, preferred_element_type=jnp.float32)                      # chunk means
    d = y - mu
    var = jnp.dot(d * d, avg, preferred_element_type=jnp.float32)                 # chunk vars
    yn = d * jax.lax.rsqrt(var + eps)
    yn = (yn * g_ref[...] + b_ref[...]).astype(o_ref.dtype)

    # Pixel shuffle via layout: columns [0,2c) are p1=0, [2c,4c) are p1=1; within each half
    # the column order is already (p2, c).  The reshapes only split the leading (token) dim,
    # the minor dim is unchanged -> free (no relayout).
    tr = o_ref.shape[0]
    c2 = 2 * c
    o_ref[:, 0] = yn[:, :c2].reshape(tr, W, c2)   # output rows 2h   (p1 = 0)
    o_ref[:, 1] = yn[:, c2:].reshape(tr, W, c2)   # output rows 2h+1 (p1 = 1)


def prepare_patch_expand_params(gamma, beta):
    """One-time parameter setup (hoisted out of the per-call wrapper).

    gamma/beta: (c,) LayerNorm affine params, c = dim // 2.
    Returns (avg, g4, b4):
      avg : (4c, 4c) block-diagonal chunk-averaging matrix (1/c within each c-chunk)
      g4  : (1, 4c)  gamma tiled over the four (p1,p2) chunks
      b4  : (1, 4c)  beta  tiled
    """
    c = gamma.shape[0]
    C2 = 4 * c
    g4 = jnp.tile(gamma.astype(jnp.float32), 4).reshape(1, C2)
    b4 = jnp.tile(beta.astype(jnp.float32), 4).reshape(1, C2)
    chunk = jnp.arange(C2, dtype=jnp.int32) // c
    avg = jnp.where(chunk[:, None] == chunk[None, :], 1.0 / c, 0.0).astype(jnp.float32)
    return avg, g4, b4


def patch_expand(x, w_expand, avg, g4, b4, *, input_resolution, eps=1e-5, rows_per_tile=None):
    """x: (B, H*W, dim) -> (B, 4*H*W, dim//2).  dim_scale=2 path of PatchExpand.

    w_expand     : (dim, 2*dim)  == torch `expand.weight.T` (columns ordered (p1, p2, c))
    avg, g4, b4  : outputs of prepare_patch_expand_params(gamma, beta)
    rows_per_tile: optional number of (b,h) output rows per grid step (default: all -> one
                   fused block).  Use for large resolutions to keep the block in the VMEM
                   sweet spot (add vmem_limit_bytes to CompilerParams on v7x if needed).
    """
    B, L, dim = x.shape
    H = W = input_resolution
    assert L == H * W, "input feature has wrong size"
    assert dim % 2 == 0
    c = dim // 2
    C2 = 2 * dim                      # expanded channels = 4*c
    M = B * L                         # all tokens: batch folded into the matmul M dim
    R = B * H                         # output (b, h) rows

    if rows_per_tile is None:
        rows_per_tile = R             # single fused block (default; best at small shapes)
    assert R % rows_per_tile == 0
    tr = rows_per_tile
    tm = tr * W
    num_tiles = R // tr
    # (8,128) rule: a partial block over the token axis must be sublane-aligned.
    assert num_tiles == 1 or tm % 8 == 0, "rows_per_tile * W must be a multiple of 8"

    x2 = x.reshape(M, dim)            # contiguous -> free

    # Advisory cost for XLA scheduling around this small custom call.
    isz = jnp.dtype(x.dtype).itemsize
    flops = 2 * M * dim * C2 + 2 * (2 * M * C2 * C2)
    bytes_accessed = (M * dim * isz + dim * C2 * jnp.dtype(w_expand.dtype).itemsize
                      + C2 * C2 * 4 + 2 * C2 * 4 + R * 2 * W * 2 * c * isz)
    cost = pl.CostEstimate(flops=flops, transcendentals=M * C2,
                           bytes_accessed=bytes_accessed)

    out = pl.pallas_call(
        partial(_patch_expand_kernel, W=W, c=c, eps=eps),
        out_shape=jax.ShapeDtypeStruct((R, 2, W, 2 * c), x.dtype),
        grid=(num_tiles,),
        in_specs=[
            pl.BlockSpec((tm, dim), lambda i: (i, 0)),     # token rows of this tile
            pl.BlockSpec((dim, C2), lambda i: (0, 0)),     # expand weight (resident)
            pl.BlockSpec((C2, C2), lambda i: (0, 0)),      # chunk-averaging matrix (resident)
            pl.BlockSpec((1, C2), lambda i: (0, 0)),       # gamma (tiled x4)
            pl.BlockSpec((1, C2), lambda i: (0, 0)),       # beta  (tiled x4)
        ],
        out_specs=pl.BlockSpec((tr, 2, W, 2 * c), lambda i: (i, 0, 0, 0)),
        compiler_params=pltpu.CompilerParams(
            # Tiles are independent; cross-TC sharding at production shapes would need
            # pltpu.CORE_PARALLEL (plain "parallel" has no measured codegen effect).
            dimension_semantics=("arbitrary",)),
        cost_estimate=cost,
    )(x2, w_expand, avg, g4, b4)

    # (R, 2, W, 2, c) row-major == 'b (h p1) (w p2) c' -> contiguous (free) reshape.
    return out.reshape(B, 4 * L, c)


# ----------------------- pure-JAX reference (for verification) -----------------------

def patch_expand_ref(x, w, g, b, input_resolution, eps=1e-5):
    H = W = input_resolution
    B, L, dim = x.shape
    y = x @ w                                                # (B, L, 2*dim)
    C = y.shape[-1]
    c = C // 4
    y = y.reshape(B, H, W, 2, 2, c)
    y = y.transpose(0, 1, 3, 2, 4, 5).reshape(B, 4 * L, c)   # einops rearrange
    mu = y.mean(-1, keepdims=True)
    var = jnp.mean(jnp.square(y - mu), -1, keepdims=True)
    return (y - mu) / jnp.sqrt(var + eps) * g + b


# ----------------------------------- main -----------------------------------

if __name__ == "__main__":
    # Shapes as used inside HTAE: dim=64, input_resolution=8 (H=W=8, L=64), batch=2.
    B, input_resolution, dim = 2, 8, 64
    H = W = input_resolution

    key = jax.random.PRNGKey(0)
    kx, kw, kg, kb = jax.random.split(key, 4)
    x = jax.random.normal(kx, (B, H * W, dim), jnp.float32)
    s = 1.0 / math.sqrt(dim)
    # torch expand.weight.T: (dim, 2*dim), columns ordered (p1, p2, c).
    w_expand = jax.random.uniform(kw, (dim, 2 * dim), jnp.float32, -s, s)
    gamma = 1.0 + 0.1 * jax.random.normal(kg, (dim // 2,), jnp.float32)
    beta = 0.1 * jax.random.normal(kb, (dim // 2,), jnp.float32)

    # One-time parameter setup (hoisted out of the forward call).
    avg, g4, b4 = prepare_patch_expand_params(gamma, beta)

    fwd = jax.jit(partial(patch_expand, input_resolution=input_resolution))
    out = fwd(x, w_expand, avg, g4, b4)
    jax.block_until_ready(out)

    assert out.shape == (B, 4 * H * W, dim // 2)
    assert bool(jnp.all(jnp.isfinite(out)))

    ref = patch_expand_ref(x, w_expand, gamma, beta, input_resolution)
    max_err = float(jnp.max(jnp.abs(out - ref)))
    # 5e-3 leaves margin for MXU f32 emulation in the stats matmuls; typically ~1e-5.
    assert max_err < 5e-3, f"mismatch vs reference: max abs err {max_err}"

    print("KERNEL_OK")
</pallas_src>

<mosaic_0001>
module attributes {stable_mosaic.version = 11 : i64} {
  func.func @_patch_expand_kernel(%arg0: i32, %arg1: memref<128x64xf32, #tpu.memory_space<vmem>>, %arg2: memref<64x128xf32, #tpu.memory_space<vmem>>, %arg3: memref<128x128xf32, #tpu.memory_space<vmem>>, %arg4: memref<1x128xf32, #tpu.memory_space<vmem>>, %arg5: memref<1x128xf32, #tpu.memory_space<vmem>>, %arg6: memref<16x2x8x64xf32, #tpu.memory_space<vmem>>) attributes {dimension_semantics = [#tpu.dimension_semantics<arbitrary>], iteration_bounds = array<i64: 1>, scalar_prefetch = 0 : i64, scratch_operands = 0 : i64, tpu.core_type = #tpu.core_type<tc>, window_params = [{transform_indices = @transform_0, window_bounds = array<i64: 128, 64>}, {pipeline_mode = #tpu.pipeline_mode<synchronous>, transform_indices = @transform_1, window_bounds = array<i64: 64, 128>}, {pipeline_mode = #tpu.pipeline_mode<synchronous>, transform_indices = @transform_2, window_bounds = array<i64: 128, 128>}, {pipeline_mode = #tpu.pipeline_mode<synchronous>, transform_indices = @transform_3, window_bounds = array<i64: 1, 128>}, {pipeline_mode = #tpu.pipeline_mode<synchronous>, transform_indices = @transform_4, window_bounds = array<i64: 1, 128>}, {transform_indices = @transform_5, window_bounds = array<i64: 16, 2, 8, 64>}]} {
    %c0 = arith.constant 0 : index
    %c0_0 = arith.constant 0 : index
    %0 = vector.load %arg1[%c0, %c0_0] : memref<128x64xf32, #tpu.memory_space<vmem>>, vector<128x64xf32>
    %c0_1 = arith.constant 0 : index
    %c0_2 = arith.constant 0 : index
    %1 = vector.load %arg2[%c0_1, %c0_2] : memref<64x128xf32, #tpu.memory_space<vmem>>, vector<64x128xf32>
    %cst = arith.constant dense<0.000000e+00> : vector<128x128xf32>
    %2 = tpu.matmul %0, %1, %cst {dimension_numbers = #tpu.dot_dimension_numbers<[1], [0], [0], [1], [0, 0, 1, 1], [], []>} : vector<128x64xf32>, vector<64x128xf32>, vector<128x128xf32> -> vector<128x128xf32>
    %c0_3 = arith.constant 0 : index
    %c0_4 = arith.constant 0 : index
    %3 = vector.load %arg3[%c0_3, %c0_4] : memref<128x128xf32, #tpu.memory_space<vmem>>, vector<128x128xf32>
    %cst_5 = arith.constant dense<0.000000e+00> : vector<128x128xf32>
    %4 = tpu.matmul %2, %3, %cst_5 {dimension_numbers = #tpu.dot_dimension_numbers<[1], [0], [0], [1], [0, 0, 1, 1], [], []>} : vector<128x128xf32>, vector<128x128xf32>, vector<128x128xf32> -> vector<128x128xf32>
    %5 = arith.subf %2, %4 : vector<128x128xf32>
    %6 = arith.mulf %5, %5 : vector<128x128xf32>
    %cst_6 = arith.constant dense<0.000000e+00> : vector<128x128xf32>
    %7 = tpu.matmul %6, %3, %cst_6 {dimension_numbers = #tpu.dot_dimension_numbers<[1], [0], [0], [1], [0, 0, 1, 1], [], []>} : vector<128x128xf32>, vector<128x128xf32>, vector<128x128xf32> -> vector<128x128xf32>
    %cst_7 = arith.constant 9.99999974E-6 : f32
    %8 = vector.broadcast %cst_7 : f32 to vector<128x128xf32>
    %9 = arith.addf %7, %8 : vector<128x128xf32>
    %10 = math.rsqrt %9 : vector<128x128xf32>
    %11 = arith.mulf %5, %10 : vector<128x128xf32>
    %c0_8 = arith.constant 0 : index
    %c0_9 = arith.constant 0 : index
    %12 = vector.load %arg4[%c0_8, %c0_9] : memref<1x128xf32, #tpu.memory_space<vmem>>, vector<1x128xf32>
    %13 = vector.broadcast %12 : vector<1x128xf32> to vector<128x128xf32>
    %14 = arith.mulf %11, %13 : vector<128x128xf32>
    %c0_10 = arith.constant 0 : index
    %c0_11 = arith.constant 0 : index
    %15 = vector.load %arg5[%c0_10, %c0_11] : memref<1x128xf32, #tpu.memory_space<vmem>>, vector<1x128xf32>
    %16 = vector.broadcast %15 : vector<1x128xf32> to vector<128x128xf32>
    %17 = arith.addf %14, %16 : vector<128x128xf32>
    %18 = vector.extract_strided_slice %17 {offsets = [0, 0], sizes = [128, 64], strides = [1, 1]} : vector<128x128xf32> to vector<128x64xf32>
    %19 = vector.shape_cast %18 : vector<128x64xf32> to vector<16x8x64xf32>
    %c0_12 = arith.constant 0 : index
    %c0_13 = arith.constant 0 : index
    %c0_14 = arith.constant 0 : index
    %c0_15 = arith.constant 0 : index
    %20 = vector.load %arg6[%c0_12, %c0_13, %c0_14, %c0_15] : memref<16x2x8x64xf32, #tpu.memory_space<vmem>>, vector<16x1x8x64xf32>
    %21 = vector.shape_cast %20 : vector<16x1x8x64xf32> to vector<16x8x64xf32>
    %22 = vector.shape_cast %19 : vector<16x8x64xf32> to vector<16x1x8x64xf32>
    tpu.vector_store %arg6[%c0_12, %c0_13, %c0_14, %c0_15], %22 {strides = array<i32>} : memref<16x2x8x64xf32, #tpu.memory_space<vmem>>, vector<16x1x8x64xf32>,
    %23 = vector.extract_strided_slice %17 {offsets = [0, 64], sizes = [128, 64], strides = [1, 1]} : vector<128x128xf32> to vector<128x64xf32>
    %24 = vector.shape_cast %23 : vector<128x64xf32> to vector<16x8x64xf32>
    %c0_16 = arith.constant 0 : index
    %c1 = arith.constant 1 : index
    %c0_17 = arith.constant 0 : index
    %c0_18 = arith.constant 0 : index
    %25 = vector.load %arg6[%c0_16, %c1, %c0_17, %c0_18] : memref<16x2x8x64xf32, #tpu.memory_space<vmem>>, vector<16x1x8x64xf32>
    %26 = vector.shape_cast %25 : vector<16x1x8x64xf32> to vector<16x8x64xf32>
    %27 = vector.shape_cast %24 : vector<16x8x64xf32> to vector<16x1x8x64xf32>
    tpu.vector_store %arg6[%c0_16, %c1, %c0_17, %c0_18], %27 {strides = array<i32>} : memref<16x2x8x64xf32, #tpu.memory_space<vmem>>, vector<16x1x8x64xf32>,
    return
  }
  func.func @transform_0(%arg0: i32) -> (i32, i32) {
    %c0_i32 = arith.constant 0 : i32
    %c0_i32_0 = arith.constant 0 : i32
    return %arg0, %c0_i32 : i32, i32
  }
  func.func @transform_1(%arg0: i32) -> (i32, i32) {
    %c0_i32 = arith.constant 0 : i32
    %c0_i32_0 = arith.constant 0 : i32
    %c0_i32_1 = arith.constant 0 : i32
    return %c0_i32, %c0_i32_0 : i32, i32
  }
  func.func @transform_2(%arg0: i32) -> (i32, i32) {
    %c0_i32 = arith.constant 0 : i32
    %c0_i32_0 = arith.constant 0 : i32
    %c0_i32_1 = arith.constant 0 : i32
    return %c0_i32, %c0_i32_0 : i32, i32
  }
  func.func @transform_3(%arg0: i32) -> (i32, i32) {
    %c0_i32 = arith.constant 0 : i32
    %c0_i32_0 = arith.constant 0 : i32
    %c0_i32_1 = arith.constant 0 : i32
    return %c0_i32, %c0_i32_0 : i32, i32
  }
  func.func @transform_4(%arg0: i32) -> (i32, i32) {
    %c0_i32 = arith.constant 0 : i32
    %c0_i32_0 = arith.constant 0 : i32
    %c0_i32_1 = arith.constant 0 : i32
    return %c0_i32, %c0_i32_0 : i32, i32
  }
  func.func @transform_5(%arg0: i32) -> (i32, i32, i32, i32) {
    %c0_i32 = arith.constant 0 : i32
    %c0_i32_0 = arith.constant 0 : i32
    %c0_i32_1 = arith.constant 0 : i32
    %c0_i32_2 = arith.constant 0 : i32
    return %arg0, %c0_i32, %c0_i32_0, %c0_i32_1 : i32, i32, i32, i32
  }
}

</mosaic_0001>

<bundles_post_ra>
// kernel: patch_expand.1
= control target key start
LH: loop header
LB: loop body
LE: loop exit
PB: predicated region body
PF: predicated region fallthrough
CT: control target
= control target key end

     0   :  { %10 = vsyncpa [#allocation3], 0  ;;  %s1710_s0 = inlined_call_operand.hbm [shape: f32[128,64], index: 0, kind: input, shape index: {}]   ;;  %s1711_s1 = inlined_call_operand.hbm [shape: f32[64,128], index: 1, kind: input, shape index: {}]   ;;  %s1712_s2 = inlined_call_operand.hbm [shape: f32[128,128], index: 2, kind: input, shape index: {}]   ;;  %s1713_s3 = inlined_call_operand.vmem [shape: f32[1,128], index: 3, kind: input, shape index: {}]   ;;  %s1714_s4 = inlined_call_operand.vmem [shape: f32[1,128], index: 4, kind: input, shape index: {}]   ;;  %s1715_s5 = inlined_call_operand.vmem [shape: f32[16,2,8,64], index: 5, kind: output, shape index: {}]  }
   0x1   :  { %11 = vsyncpa [#allocation5], 0  ;;  %s1276_s18 = smov [#allocation4]   ;;  %s1277_s20 = smov [#allocation2]  }
   0x2   :  { %s29_s19 = sshll.u32 %s1276_s18, 4  ;;  %s17_s21 = sshll.u32 %s1277_s20, 4  ;;  %s30_s19 = int_to_ptr.vmem [resolvable:$true] %s29_s19  ;;  %s1312_s21 = int_to_ptr.vmem [resolvable:$true] %s17_s21 }
   0x3   :  { %s1206_s24 = scalar_lea.hbm %s1711_s1, 1024 }
   0x4   :  { %p1207_p0 = scmp.ne.s32.totalorder %s1711_s1, %s1206_s24  ;;  %p1210_p1 = scmp.lt.u32.totalorder %s1206_s24, %s1711_s1 }
   0x6   :  { %p1212_p2 = pnand %p1210_p1, %p1207_p0 }
   0x8   :  { %1215 = shalt.err (!%p1212_p2)
}
   0x9   :  { %s1216_s29 = scalar_lea.vmem %s30_s19, 1024  ;;  %p1221_p4 = scmp.lt.s32.totalorder %s30_s19, %s30_s19 }
   0xa   :  { %p1217_p3 = scmp.ne.s32.totalorder %s30_s19, %s1216_s29  ;;  %p1222_p5 = scmp.lt.s32.totalorder %s1216_s29, %s1216_s29 }
   0xc   :  { %p1223_p6 = por %p1222_p5, %p1221_p4 }
   0xe   :  { %p1224_p7 = pnand %p1223_p6, %p1217_p3 }
  0x10   :  { %1227 = shalt.err (!%p1224_p7)
}
  0x11   :  { %s1278_s30 = smov 128   ;;  %s1279_s6 = smov 8  }
  0x12   :  { %35 = dma.hbm_to_vmem [thread:$0]  %s1711_s1, 1024, %s30_s19, [#allocation5], %s1278_s30, %s1278_s30, %s1279_s6  }
  0x13   :  { %s1228_s11 = scalar_lea.hbm %s1710_s0, 2048 }
  0x14   :  { %p1229_p8 = scmp.ne.s32.totalorder %s1710_s0, %s1228_s11  ;;  %p1232_p9 = scmp.lt.u32.totalorder %s1228_s11, %s1710_s0 }
  0x16   :  { %p1234_p10 = pnand %p1232_p9, %p1229_p8 }
  0x18   :  { %1237 = shalt.err (!%p1234_p10)
}
  0x19   :  { %s1238_s16 = scalar_lea.vmem %s1312_s21, 2048  ;;  %p1243_p12 = scmp.lt.s32.totalorder %s1312_s21, %s1312_s21 }
  0x1a   :  { %p1239_p11 = scmp.ne.s32.totalorder %s1312_s21, %s1238_s16  ;;  %p1244_p13 = scmp.lt.s32.totalorder %s1238_s16, %s1238_s16 }
  0x1c   :  { %p1245_p0 = por %p1244_p13, %p1243_p12 }
  0x1e   :  { %p1246_p1 = pnand %p1245_p0, %p1239_p11 }
  0x20   :  { %1249 = shalt.err (!%p1246_p1)
}
  0x21   :  { %23 = dma.hbm_to_vmem [thread:$0]  %s1710_s0, 2048, %s1312_s21, [#allocation3], %s1278_s30, %s1278_s30, %s1279_s6  }
  0x22   :  { %s1280_s18 = smov [#allocation6]   ;;  %s1250_s23 = scalar_lea.hbm %s1712_s2, 2048 }
  0x23   :  { %s41_s19 = sshll.u32 %s1280_s18, 4  ;;  %p1251_p2 = scmp.ne.s32.totalorder %s1712_s2, %s1250_s23  ;;  %s42_s19 = int_to_ptr.vmem [resolvable:$true] %s41_s19 }
  0x24   :  { %p1254_p3 = scmp.lt.u32.totalorder %s1250_s23, %s1712_s2 }
  0x26   :  { %p1256_p4 = pnand %p1254_p3, %p1251_p2 }
  0x28   :  { %1259 = shalt.err (!%p1256_p4)
}
  0x29   :  { %s1260_s28 = scalar_lea.vmem %s42_s19, 2048  ;;  %p1265_p6 = scmp.lt.s32.totalorder %s42_s19, %s42_s19 }
  0x2a   :  { %p1261_p5 = scmp.ne.s32.totalorder %s42_s19, %s1260_s28  ;;  %p1266_p7 = scmp.lt.s32.totalorder %s1260_s28, %s1260_s28 }
  0x2c   :  { %p1267_p8 = por %p1266_p7, %p1265_p6 }
  0x2e   :  { %p1268_p9 = pnand %p1267_p8, %p1261_p5 }
  0x30   :  { %1271 = shalt.err (!%p1268_p9)
}
  0x31   :  { %47 = dma.hbm_to_vmem [thread:$0]  %s1712_s2, 2048, %s42_s19, [#allocation5], %s1278_s30, %s1278_s30, %s1279_s6  }
  0x32   :  { %1272 = dma.done.wait [#allocation3], 2048  }
  0x33   :  { %1273 = vsyncadd [#allocation3], 4294965248 }
  0x34   :  { %1274 = dma.done.wait [#allocation5], 3072  }
  0x35   :  { %1275 = vsyncadd [#allocation5], 4294964224  ;;  %v77_v0 = vld [vmem:[#allocation4] sm:$0xff]  ;;  %v78_v1 = vld [vmem:[#allocation4 + $0x8] sm:$0xff]  ;;  %vm85_vm0 = vcmask 523264  }
  0x36   :  { %v79_v2 = vld [vmem:[#allocation4 + $0x10] sm:$0xff]  ;;  %v1072_v3 = vpack.c.bf16 %v78_v1, %v77_v0  ;;  %v80_v4 = vld [vmem:[#allocation4 + $0x18] sm:$0xff]  ;;  %v81_v6 = vld [vmem:[#allocation4 + $0x20] sm:$0xff] }
  0x37   :  { %v1076_v5 = vpack.c.bf16 %v80_v4, %v79_v2  ;;  %v82_v7 = vld [vmem:[#allocation4 + $0x28] sm:$0xff]  ;;  %v61_v8 = vld [vmem:[#allocation2] sm:$0xff]  ;;  %v83_v10 = vld [vmem:[#allocation4 + $0x30] sm:$0xff] }
  0x38   :  { %1073 = vmatprep.subr.bf16.mxu0 %v1072_v3  ;;  %936 = vmatprep.mubr.msk.f32.mxu0 %vm85_vm0, %v61_v8  ;;  %v1080_v9 = vpack.c.bf16 %v82_v7, %v81_v6  ;;  %v84_v11 = vld [vmem:[#allocation4 + $0x38] sm:$0xff]  ;;  %v279_v12 = vld [vmem:[#allocation6] sm:$0xff]  ;;  %v280_v13 = vld [vmem:[#allocation6 + $0x8] sm:$0xff] }
  0x39   :  { %1075 = vmatpush3.bf16.msra.mxu0 %v1072_v3  ;;  %v281_v14 = vld [vmem:[#allocation6 + $0x10] sm:$0xff]  ;;  %v1084_v15 = vpack.c.bf16 %v84_v11, %v83_v10  ;;  %v1365_v16 = vpack.c.bf16 %v280_v13, %v279_v12  ;;  %v282_v17 = vld [vmem:[#allocation6 + $0x18] sm:$0xff]  ;;  %v283_v19 = vld [vmem:[#allocation6 + $0x20] sm:$0xff] }
  0x3a   :  { %1077 = vmatprep.subr.bf16.mxu0 %v1076_v5  ;;  %v1367_v18 = vpack.c.bf16 %v282_v17, %v281_v14  ;;  %v284_v20 = vld [vmem:[#allocation6 + $0x28] sm:$0xff]  ;;  %v285_v22 = vld [vmem:[#allocation6 + $0x30] sm:$0xff]  ;;  %v286_v23 = vld [vmem:[#allocation6 + $0x38] sm:$0xff] }
  0x3b   :  { %1089 = vmatprep.subr.bf16.mxu1 %v1365_v16  ;;  %v1372_v21 = vpack.c.bf16 %v284_v20, %v283_v19  ;;  %v62_v24 = vld [vmem:[#allocation2 + $0x8] sm:$0xff]  ;;  %v63_v25 = vld [vmem:[#allocation2 + $0x10] sm:$0xff]  ;;  %v1376_v26 = vpack.c.bf16 %v286_v23, %v285_v22  ;;  %v287_v27 = vld [vmem:[#allocation6 + $0x40] sm:$0xff] }
  0x3c   :  { %1091 = vmatpush3.bf16.msra.mxu1 %v1365_v16  ;;  %v288_v28 = vld [vmem:[#allocation6 + $0x48] sm:$0xff]  ;;  %v64_v29 = vld [vmem:[#allocation2 + $0x18] sm:$0xff]  ;;  %v65_v30 = vld [vmem:[#allocation2 + $0x20] sm:$0xff] }
  0x3d   :  { %1079 = vmatpush3.bf16.msra.mxu0 %v1076_v5  ;;  %1093 = vmatprep.subr.bf16.mxu1 %v1367_v18  ;;  %v1383_v31 = vpack.c.bf16 %v288_v28, %v287_v27  ;;  %v289_v32 = vld [vmem:[#allocation6 + $0x50] sm:$0xff]  ;;  %v290_v33 = vld [vmem:[#allocation6 + $0x58] sm:$0xff]  ;;  %v66_v34 = vld [vmem:[#allocation2 + $0x28] sm:$0xff] }
  0x3e   :  { %1081 = vmatprep.subr.bf16.mxu0 %v1080_v9  ;;  %v67_v35 = vld [vmem:[#allocation2 + $0x30] sm:$0xff]  ;;  %v1391_v36 = vpack.c.bf16 %v290_v33, %v289_v32  ;;  %v291_v37 = vld [vmem:[#allocation6 + $0x60] sm:$0xff]  ;;  %v292_v38 = vld [vmem:[#allocation6 + $0x68] sm:$0xff] }
  0x3f   :  { %v68_v39 = vld [vmem:[#allocation2 + $0x38] sm:$0xff]  ;;  %v69_v40 = vld [vmem:[#allocation2 + $0x40] sm:$0xff]  ;;  %v1399_v41 = vpack.c.bf16 %v292_v38, %v291_v37  ;;  %v293_v42 = vld [vmem:[#allocation6 + $0x70] sm:$0xff] }
  0x40   :  { %1095 = vmatpush3.bf16.msra.mxu1 %v1367_v18  ;;  %v294_v43 = vld [vmem:[#allocation6 + $0x78] sm:$0xff]  ;;  %v70_v44 = vld [vmem:[#allocation2 + $0x48] sm:$0xff]  ;;  %v71_v45 = vld [vmem:[#allocation2 + $0x50] sm:$0xff] }
  0x41   :  { %1083 = vmatpush3.bf16.msra.mxu0 %v1080_v9  ;;  %1097 = vmatprep.subr.bf16.mxu1 %v1372_v21  ;;  %v1407_v46 = vpack.c.bf16 %v294_v43, %v293_v42  ;;  %v72_v47 = vld [vmem:[#allocation2 + $0x58] sm:$0xff]  ;;  %v73_v48 = vld [vmem:[#allocation2 + $0x60] sm:$0xff]  ;;  %v74_v49 = vld [vmem:[#allocation2 + $0x68] sm:$0xff] }
  0x42   :  { %1085 = vmatprep.subr.bf16.mxu0 %v1084_v15  ;;  %v75_v50 = vld [vmem:[#allocation2 + $0x70] sm:$0xff]  ;;  %v76_v51 = vld [vmem:[#allocation2 + $0x78] sm:$0xff] }
  0x44   :  { %1099 = vmatpush3.bf16.msra.mxu1 %v1372_v21 }
  0x45   :  { %1087 = vmatpush3.bf16.msra.mxu0 %v1084_v15  ;;  %1101 = vmatprep.subr.bf16.mxu1 %v1376_v26 }
  0x46   :  { %1121 = vmatprep.subr.bf16.mxu0 %v1365_v16 }
  0x48   :  { %937 = vmatmul.mubr.msk.f32.vlgmr.msra.gmra.mrb[0].mxu0 %vm85_vm0, %v62_v24  ;;  %1103 = vmatpush3.bf16.msra.mxu1 %v1376_v26 }
  0x49   :  { %939 = vmatprep.mubr.msk.f32.mxu0 %vm85_vm0, %v63_v25  ;;  %1123 = vmatpush3.bf16.msra.mxu0 %v1365_v16 }
  0x4a   :  { %1125 = vmatprep.subr.bf16.mxu0 %v1367_v18  ;;  %1105 = vmatprep.subr.bf16.mxu1 %v1383_v31 }
  0x4c   :  { %940 = vmatmul.mubr.msk.f32.gmra.mrb[2].mxu0 %vm85_vm0, %v64_v29  ;;  %1107 = vmatpush3.bf16.msra.mxu1 %v1383_v31 }
  0x4d   :  { %942 = vmatprep.mubr.msk.f32.mxu0 %vm85_vm0, %v65_v30  ;;  %1127 = vmatpush3.bf16.msra.mxu0 %v1367_v18 }
  0x4e   :  { %1129 = vmatprep.subr.bf16.mxu0 %v1372_v21  ;;  %1109 = vmatprep.subr.bf16.mxu1 %v1391_v36 }
  0x50   :  { %943 = vmatmul.mubr.msk.f32.gmra.mrb[4].mxu0 %vm85_vm0, %v66_v34  ;;  %1111 = vmatpush3.bf16.msra.mxu1 %v1391_v36 }
  0x51   :  { %945 = vmatprep.mubr.msk.f32.mxu0 %vm85_vm0, %v67_v35  ;;  %1131 = vmatpush3.bf16.msra.mxu0 %v1372_v21 }
  0x52   :  { %1133 = vmatprep.subr.bf16.mxu0 %v1376_v26  ;;  %1113 = vmatprep.subr.bf16.mxu1 %v1399_v41 }
  0x54   :  { %946 = vmatmul.mubr.msk.f32.gmra.mrb[6].mxu0 %vm85_vm0, %v68_v39  ;;  %1115 = vmatpush3.bf16.msra.mxu1 %v1399_v41 }
  0x55   :  { %948 = vmatprep.mubr.msk.f32.mxu0 %vm85_vm0, %v69_v40  ;;  %1135 = vmatpush3.bf16.msra.mxu0 %v1376_v26 }
  0x56   :  { %1137 = vmatprep.subr.bf16.mxu0 %v1383_v31  ;;  %1117 = vmatprep.subr.bf16.mxu1 %v1407_v46 }
  0x58   :  { %949 = vmatmul.mubr.msk.f32.gmra.mrb[8].mxu0 %vm85_vm0, %v70_v44  ;;  %1119 = vmatpush3.bf16.msra.mxu1 %v1407_v46 }
  0x59   :  { %951 = vmatprep.mubr.msk.f32.mxu0 %vm85_vm0, %v71_v45  ;;  %1139 = vmatpush3.bf16.msra.mxu0 %v1383_v31 }
  0x5a   :  { %1141 = vmatprep.subr.bf16.mxu0 %v1391_v36  ;;  %1152 = vmatprep.subr.bf16.mxu1 %v1365_v16 }
  0x5c   :  { %952 = vmatmul.mubr.msk.f32.gmra.mrb[10].mxu0 %vm85_vm0, %v72_v47 }
  0x5d   :  { %954 = vmatprep.mubr.msk.f32.mxu0 %vm85_vm0, %v73_v48  ;;  %1143 = vmatpush3.bf16.msra.mxu0 %v1391_v36 }
  0x5e   :  { %1145 = vmatprep.subr.bf16.mxu0 %v1399_v41 }
  0x60   :  { %955 = vmatmul.mubr.msk.f32.gmra.mrb[12].mxu0 %vm85_vm0, %v74_v49 }
  0x61   :  { %957 = vmatprep.mubr.msk.f32.mxu0 %vm85_vm0, %v75_v50  ;;  %1147 = vmatpush3.bf16.msra.mxu0 %v1399_v41 }
  0x62   :  { %1149 = vmatprep.subr.bf16.mxu0 %v1407_v46 }
  0x64   :  { %958 = vmatmul.mubr.msk.f32.gmra.mrb[14].mxu0 %vm85_vm0, %v76_v51 }
  0x65   :  { %1151 = vmatpush3.bf16.msra.mxu0 %v1407_v46 }
 0x11b   :  { %v938_v52 = vpop.f32.mrb[0].mxu0 }
 0x11c   :  { %v200_v53 = vpop.f32.mrb[1].mxu0 }
 0x11d   :  { %992 = vmatprep.mubr.f32.mxu1 %v200_v53 }
 0x11e   :  { %993 = vmatmul.mubr.f32.vlgmr.msra.gmra.mrb[0].mxu1 %v938_v52 }
 0x11f   :  { %v941_v54 = vpop.f32.mrb[2].mxu0  ;;  %1160 = vmatpush3.bf16.msra.mxu1 %v1365_v16 }
 0x120   :  { %v210_v55 = vpop.f32.mrb[3].mxu0  ;;  %1153 = vmatprep.subr.bf16.mxu1 %v1367_v18 }
 0x121   :  { %995 = vmatprep.mubr.f32.mxu1 %v210_v55 }
 0x122   :  { %996 = vmatmul.mubr.f32.gmra.mrb[2].mxu1 %v941_v54 }
 0x123   :  { %v944_v56 = vpop.f32.mrb[4].mxu0  ;;  %1161 = vmatpush3.bf16.msra.mxu1 %v1367_v18 }
 0x124   :  { %v220_v57 = vpop.f32.mrb[5].mxu0  ;;  %1154 = vmatprep.subr.bf16.mxu1 %v1372_v21 }
 0x125   :  { %998 = vmatprep.mubr.f32.mxu1 %v220_v57 }
 0x126   :  { %999 = vmatmul.mubr.f32.gmra.mrb[4].mxu1 %v944_v56 }
 0x127   :  { %v947_v58 = vpop.f32.mrb[6].mxu0  ;;  %1162 = vmatpush3.bf16.msra.mxu1 %v1372_v21 }
 0x128   :  { %v230_v59 = vpop.f32.mrb[7].mxu0  ;;  %1155 = vmatprep.subr.bf16.mxu1 %v1376_v26 }
 0x129   :  { %1001 = vmatprep.mubr.f32.mxu1 %v230_v59 }
 0x12a   :  { %1002 = vmatmul.mubr.f32.gmra.mrb[6].mxu1 %v947_v58 }
 0x12b   :  { %v950_v60 = vpop.f32.mrb[8].mxu0  ;;  %1163 = vmatpush3.bf16.msra.mxu1 %v1376_v26 }
 0x12c   :  { %v240_v61 = vpop.f32.mrb[9].mxu0  ;;  %1156 = vmatprep.subr.bf16.mxu1 %v1383_v31 }
 0x12d   :  { %1004 = vmatprep.mubr.f32.mxu1 %v240_v61 }
 0x12e   :  { %1005 = vmatmul.mubr.f32.gmra.mrb[8].mxu1 %v950_v60 }
 0x12f   :  { %v953_v62 = vpop.f32.mrb[10].mxu0  ;;  %1164 = vmatpush3.bf16.msra.mxu1 %v1383_v31 }
 0x130   :  { %v250_v63 = vpop.f32.mrb[11].mxu0  ;;  %1157 = vmatprep.subr.bf16.mxu1 %v1391_v36 }
 0x131   :  { %1007 = vmatprep.mubr.f32.mxu1 %v250_v63 }
 0x132   :  { %1008 = vmatmul.mubr.f32.gmra.mrb[10].mxu1 %v953_v62 }
 0x133   :  { %v956_v0 = vpop.f32.mrb[12].mxu0  ;;  %1165 = vmatpush3.bf16.msra.mxu1 %v1391_v36 }
 0x134   :  { %v260_v1 = vpop.f32.mrb[13].mxu0  ;;  %1158 = vmatprep.subr.bf16.mxu1 %v1399_v41 }
 0x135   :  { %1010 = vmatprep.mubr.f32.mxu1 %v260_v1 }
 0x136   :  { %1011 = vmatmul.mubr.f32.gmra.mrb[12].mxu1 %v956_v0 }
 0x137   :  { %v959_v2 = vpop.f32.mrb[14].mxu0  ;;  %1166 = vmatpush3.bf16.msra.mxu1 %v1399_v41 }
 0x138   :  { %v270_v3 = vpop.f32.mrb[15].mxu0  ;;  %1159 = vmatprep.subr.bf16.mxu1 %v1407_v46 }
 0x139   :  { %1013 = vmatprep.mubr.f32.mxu1 %v270_v3 }
 0x13a   :  { %1014 = vmatmul.mubr.f32.gmra.mrb[14].mxu1 %v959_v2 }
 0x13b   :  { %1167 = vmatpush3.bf16.msra.mxu1 %v1407_v46 }
 0x1f1   :  { %v994_v4 = vpop.f32.mrb[0].mxu1 }
 0x1f2   :  { %v1444_v5 = vsub.f32 %v938_v52, %v994_v4  ;;  %v361_v6 = vpop.f32.mrb[1].mxu1  ;;  %v1511_v4 = vld [vmem:[%s1713_s3] ss:$0 sm:$0xff]  ;;  %s1281_s3 = smov 64  }
 0x1f3   :  { %v1446_v7 = vsub.f32 %v200_v53, %v361_v6 }
 0x1f4   :  { %v457_v10 = vmul.f32 %v1444_v5, %v1444_v5 }
 0x1f5   :  { %v456_v8 = vmul.f32 %v1446_v7, %v1446_v7  ;;  %v997_v9 = vpop.f32.mrb[2].mxu1 }
 0x1f6   :  { %v1452_v11 = vsub.f32 %v941_v54, %v997_v9  ;;  %v371_v12 = vpop.f32.mrb[3].mxu1 }
 0x1f7   :  { %v1454_v13 = vsub.f32 %v210_v55, %v371_v12  ;;  %1048 = vmatprep.mubr.f32.mxu0 %v456_v8 }
 0x1f8   :  { %1049 = vmatmul.mubr.f32.vlgmr.msra.gmra.mrb[16].mxu0 %v457_v10  ;;  %v459_v16 = vmul.f32 %v1452_v11, %v1452_v11  ;;  %v1517_v10 = vld [vmem:[%s1714_s4] ss:$0 sm:$0xff] }
 0x1f9   :  { %v458_v14 = vmul.f32 %v1454_v13, %v1454_v13  ;;  %v1000_v15 = vpop.f32.mrb[4].mxu1 }
 0x1fa   :  { %v1460_v17 = vsub.f32 %v944_v56, %v1000_v15  ;;  %v381_v18 = vpop.f32.mrb[5].mxu1 }
 0x1fb   :  { %v1462_v19 = vsub.f32 %v220_v57, %v381_v18  ;;  %1051 = vmatprep.mubr.f32.mxu0 %v458_v14 }
 0x1fc   :  { %1052 = vmatmul.mubr.f32.gmra.mrb[18].mxu0 %v459_v16  ;;  %v461_v22 = vmul.f32 %v1460_v17, %v1460_v17 }
 0x1fd   :  { %v460_v20 = vmul.f32 %v1462_v19, %v1462_v19  ;;  %v1003_v21 = vpop.f32.mrb[6].mxu1 }
 0x1fe   :  { %v1468_v23 = vsub.f32 %v947_v58, %v1003_v21  ;;  %v391_v24 = vpop.f32.mrb[7].mxu1 }
 0x1ff   :  { %v1470_v25 = vsub.f32 %v230_v59, %v391_v24  ;;  %1054 = vmatprep.mubr.f32.mxu0 %v460_v20 }
 0x200   :  { %1055 = vmatmul.mubr.f32.gmra.mrb[20].mxu0 %v461_v22  ;;  %v463_v28 = vmul.f32 %v1468_v23, %v1468_v23 }
 0x201   :  { %v462_v26 = vmul.f32 %v1470_v25, %v1470_v25  ;;  %v1006_v27 = vpop.f32.mrb[8].mxu1 }
 0x202   :  { %v1476_v29 = vsub.f32 %v950_v60, %v1006_v27  ;;  %v401_v30 = vpop.f32.mrb[9].mxu1 }
 0x203   :  { %v1478_v31 = vsub.f32 %v240_v61, %v401_v30  ;;  %1057 = vmatprep.mubr.f32.mxu0 %v462_v26 }
 0x204   :  { %1058 = vmatmul.mubr.f32.gmra.mrb[22].mxu0 %v463_v28  ;;  %v465_v34 = vmul.f32 %v1476_v29, %v1476_v29 }
 0x205   :  { %v464_v32 = vmul.f32 %v1478_v31, %v1478_v31  ;;  %v1009_v33 = vpop.f32.mrb[10].mxu1 }
 0x206   :  { %v1484_v35 = vsub.f32 %v953_v62, %v1009_v33  ;;  %v411_v36 = vpop.f32.mrb[11].mxu1 }
 0x207   :  { %v1486_v37 = vsub.f32 %v250_v63, %v411_v36  ;;  %1060 = vmatprep.mubr.f32.mxu0 %v464_v32 }
 0x208   :  { %1061 = vmatmul.mubr.f32.gmra.mrb[24].mxu0 %v465_v34  ;;  %v467_v40 = vmul.f32 %v1484_v35, %v1484_v35 }
 0x209   :  { %v466_v38 = vmul.f32 %v1486_v37, %v1486_v37  ;;  %v1012_v39 = vpop.f32.mrb[12].mxu1 }
 0x20a   :  { %v1492_v41 = vsub.f32 %v956_v0, %v1012_v39  ;;  %v421_v42 = vpop.f32.mrb[13].mxu1 }
 0x20b   :  { %v1494_v43 = vsub.f32 %v260_v1, %v421_v42  ;;  %1063 = vmatprep.mubr.f32.mxu0 %v466_v38 }
 0x20c   :  { %1064 = vmatmul.mubr.f32.gmra.mrb[26].mxu0 %v467_v40  ;;  %v469_v46 = vmul.f32 %v1492_v41, %v1492_v41 }
 0x20d   :  { %v468_v44 = vmul.f32 %v1494_v43, %v1494_v43  ;;  %v1015_v45 = vpop.f32.mrb[14].mxu1 }
 0x20e   :  { %v1500_v47 = vsub.f32 %v959_v2, %v1015_v45  ;;  %v431_v48 = vpop.f32.mrb[15].mxu1 }
 0x20f   :  { %v1502_v49 = vsub.f32 %v270_v3, %v431_v48  ;;  %1066 = vmatprep.mubr.f32.mxu1 %v468_v44 }
 0x210   :  { %1067 = vmatmul.mubr.f32.vlgmr.msra.gmra.mrb[16].mxu1 %v469_v46  ;;  %v471_v51 = vmul.f32 %v1500_v47, %v1500_v47 }
 0x211   :  { %v470_v50 = vmul.f32 %v1502_v49, %v1502_v49 }
 0x213   :  { %1069 = vmatprep.mubr.f32.mxu1 %v470_v50 }
 0x214   :  { %1070 = vmatmul.mubr.f32.gmra.mrb[18].mxu1 %v471_v51 }
 0x2cb   :  { %v1050_v52 = vpop.f32.mrb[16].mxu0 }
 0x2cc   :  { %v544_v53 = vadd.f32 1e-05, %v1050_v52  ;;  %v538_v54 = vpop.f32.mrb[17].mxu0 }
 0x2cd   :  { %v539_v55 = vadd.f32 1e-05, %v538_v54 }
 0x2ce   :  { %1174 = vrsqrt.f32 %v544_v53 }
 0x2cf   :  { %1176 = vrsqrt.f32 %v539_v55  ;;  %v1053_v56 = vpop.f32.mrb[18].mxu0 }
 0x2d0   :  { %v554_v57 = vadd.f32 1e-05, %v1053_v56  ;;  %v548_v58 = vpop.f32.mrb[19].mxu0 }
 0x2d1   :  { %v549_v59 = vadd.f32 1e-05, %v548_v58 }
 0x2d2   :  { %1178 = vrsqrt.f32 %v554_v57 }
 0x2d3   :  { %1180 = vrsqrt.f32 %v549_v59  ;;  %v1056_v60 = vpop.f32.mrb[20].mxu0 }
 0x2d4   :  { %v564_v61 = vadd.f32 1e-05, %v1056_v60  ;;  %v558_v62 = vpop.f32.mrb[21].mxu0 }
 0x2d5   :  { %v559_v63 = vadd.f32 1e-05, %v558_v62 }
 0x2d6   :  { %1182 = vrsqrt.f32 %v564_v61 }
 0x2d7   :  { %1184 = vrsqrt.f32 %v559_v63  ;;  %v1059_v0 = vpop.f32.mrb[22].mxu0 }
 0x2d8   :  { %v1175_v1 = vpop.eup %1174  ;;  %v574_v2 = vadd.f32 1e-05, %v1059_v0  ;;  %v568_v3 = vpop.f32.mrb[23].mxu0 }
 0x2d9   :  { %v1177_v6 = vpop.eup %1176  ;;  %v569_v8 = vadd.f32 1e-05, %v568_v3  ;;  %v634_v9 = vmul.f32 %v1175_v1, %v1444_v5 }
 0x2da   :  { %1186 = vrsqrt.f32 %v574_v2  ;;  %v633_v12 = vmul.f32 %v1177_v6, %v1446_v7 }
 0x2db   :  { %1188 = vrsqrt.f32 %v569_v8  ;;  %v1062_v14 = vpop.f32.mrb[24].mxu0  ;;  %v657_v15 = vmul.f32 %v1511_v4, %v634_v9 }
 0x2dc   :  { %v1179_v16 = vpop.eup %1178  ;;  %v584_v18 = vadd.f32 1e-05, %v1062_v14  ;;  %v578_v20 = vpop.f32.mrb[25].mxu0  ;;  %v656_v21 = vmul.f32 %v1511_v4, %v633_v12 }
 0x2dd   :  { %v1181_v22 = vpop.eup %1180  ;;  %v579_v24 = vadd.f32 1e-05, %v578_v20  ;;  %v680_v5 = vadd.f32 %v1517_v10, %v657_v15  ;;  %v636_v26 = vmul.f32 %v1179_v16, %v1452_v11 }
 0x2de   :  { %1190 = vrsqrt.f32 %v584_v18  ;;  %v679_v27 = vadd.f32 %v1517_v10, %v656_v21  ;;  %v635_v7 = vmul.f32 %v1181_v22, %v1454_v13 }
 0x2df   :  { %1192 = vrsqrt.f32 %v579_v24  ;;  %729 = vrot.lane.b32.xlu0 %v680_v5, %s1281_s3  ;;  %696 = vst.msk [vmem:[%s1715_s5 + $0x10] sm:$0xff] %vm85_vm0, %v680_v5  ;;  %v1065_v28 = vpop.f32.mrb[26].mxu0  ;;  %v659_v30 = vmul.f32 %v1511_v4, %v636_v26 }
 0x2e0   :  { %v1183_v32 = vpop.eup %1182  ;;  %v594_v33 = vadd.f32 1e-05, %v1065_v28  ;;  %v588_v11 = vpop.f32.mrb[27].mxu0  ;;  %695 = vst.msk [vmem:[%s1715_s5] sm:$0xff] %vm85_vm0, %v679_v27  ;;  %v658_v13 = vmul.f32 %v1511_v4, %v635_v7 }
 0x2e1   :  { %v1185_v34 = vpop.eup %1184  ;;  %v589_v36 = vadd.f32 1e-05, %v588_v11  ;;  %v682_v38 = vadd.f32 %v1517_v10, %v659_v30  ;;  %v638_v39 = vmul.f32 %v1183_v32, %v1460_v17 }
 0x2e2   :  { %1194 = vrsqrt.f32 %v594_v33  ;;  %v681_v40 = vadd.f32 %v1517_v10, %v658_v13  ;;  %v637_v42 = vmul.f32 %v1185_v34, %v1462_v19 }
 0x2e3   :  { %1196 = vrsqrt.f32 %v589_v36  ;;  %733 = vrot.lane.b32.xlu1 %v682_v38, %s1281_s3  ;;  %698 = vst.msk [vmem:[%s1715_s5 + $0x30] sm:$0xff] %vm85_vm0, %v682_v38  ;;  %727 = vrot.lane.b32.xlu0 %v679_v27, %s1281_s3  ;;  %v1068_v44 = vpop.f32.mrb[16].mxu1  ;;  %v661_v45 = vmul.f32 %v1511_v4, %v638_v39 }
 0x2e4   :  { %v1187_v46 = vpop.eup %1186  ;;  %v604_v17 = vadd.f32 1e-05, %v1068_v44  ;;  %v598_v48 = vpop.f32.mrb[17].mxu1  ;;  %697 = vst.msk [vmem:[%s1715_s5 + $0x20] sm:$0xff] %vm85_vm0, %v681_v40  ;;  %v660_v19 = vmul.f32 %v1511_v4, %v637_v42 }
 0x2e5   :  { %v1189_v50 = vpop.eup %1188  ;;  %v599_v51 = vadd.f32 1e-05, %v598_v48  ;;  %v684_v52 = vadd.f32 %v1517_v10, %v661_v45  ;;  %v640_v53 = vmul.f32 %v1187_v46, %v1468_v23 }
 0x2e6   :  { %1198 = vrsqrt.f32 %v604_v17  ;;  %v683_v54 = vadd.f32 %v1517_v10, %v660_v19  ;;  %v639_v55 = vmul.f32 %v1189_v50, %v1470_v25 }
 0x2e7   :  { %1200 = vrsqrt.f32 %v599_v51  ;;  %731 = vrot.lane.b32.xlu1 %v681_v40, %s1281_s3  ;;  %v1071_v56 = vpop.f32.mrb[18].mxu1  ;;  %700 = vst.msk [vmem:[%s1715_s5 + $0x50] sm:$0xff] %vm85_vm0, %v684_v52  ;;  %v663_v57 = vmul.f32 %v1511_v4, %v640_v53 }
 0x2e8   :  { %v1191_v58 = vpop.eup %1190  ;;  %v614_v59 = vadd.f32 1e-05, %v1071_v56  ;;  %699 = vst.msk [vmem:[%s1715_s5 + $0x40] sm:$0xff] %vm85_vm0, %v683_v54  ;;  %735 = vrot.lane.b32.xlu0 %v683_v54, %s1281_s3  ;;  %v608_v23 = vpop.f32.mrb[19].mxu1  ;;  %v662_v25 = vmul.f32 %v1511_v4, %v639_v55 }
 0x2e9   :  { %v1193_v60 = vpop.eup %1192  ;;  %v609_v61 = vadd.f32 1e-05, %v608_v23  ;;  %v686_v62 = vadd.f32 %v1517_v10, %v663_v57  ;;  %v642_v63 = vmul.f32 %v1191_v58, %v1476_v29 }
 0x2ea   :  { %1202 = vrsqrt.f32 %v614_v59  ;;  %v685_v0 = vadd.f32 %v1517_v10, %v662_v25  ;;  %v641_v1 = vmul.f32 %v1193_v60, %v1478_v31 }
 0x2eb   :  { %1204 = vrsqrt.f32 %v609_v61  ;;  %737 = vrot.lane.b32.xlu1 %v684_v52, %s1281_s3  ;;  %702 = vst.msk [vmem:[%s1715_s5 + $0x70] sm:$0xff] %vm85_vm0, %v686_v62  ;;  %v665_v2 = vmul.f32 %v1511_v4, %v642_v63 }
 0x2ec   :  { %v1195_v3 = vpop.eup %1194  ;;  %701 = vst.msk [vmem:[%s1715_s5 + $0x60] sm:$0xff] %vm85_vm0, %v685_v0  ;;  %739 = vrot.lane.b32.xlu0 %v685_v0, %s1281_s3  ;;  %v664_v29 = vmul.f32 %v1511_v4, %v641_v1 }
 0x2ed   :  { %v1197_v31 = vpop.eup %1196  ;;  %v688_v6 = vadd.f32 %v1517_v10, %v665_v2  ;;  %v644_v8 = vmul.f32 %v1195_v3, %v1484_v35 }
 0x2ee   :  { %v687_v9 = vadd.f32 %v1517_v10, %v664_v29  ;;  %v643_v12 = vmul.f32 %v1197_v31, %v1486_v37 }
 0x2ef   :  { %741 = vrot.lane.b32.xlu1 %v686_v62, %s1281_s3  ;;  %704 = vst.msk [vmem:[%s1715_s5 + $0x90] sm:$0xff] %vm85_vm0, %v688_v6  ;;  %v667_v14 = vmul.f32 %v1511_v4, %v644_v8 }
 0x2f0   :  { %v1199_v15 = vpop.eup %1198  ;;  %703 = vst.msk [vmem:[%s1715_s5 + $0x80] sm:$0xff] %vm85_vm0, %v687_v9  ;;  %743 = vrot.lane.b32.xlu0 %v687_v9, %s1281_s3  ;;  %v666_v35 = vmul.f32 %v1511_v4, %v643_v12 }
 0x2f1   :  { %v1201_v37 = vpop.eup %1200  ;;  %v690_v16 = vadd.f32 %v1517_v10, %v667_v14  ;;  %v646_v18 = vmul.f32 %v1199_v15, %v1492_v41 }
 0x2f2   :  { %v689_v20 = vadd.f32 %v1517_v10, %v666_v35  ;;  %v645_v21 = vmul.f32 %v1201_v37, %v1494_v43 }
 0x2f3   :  { %745 = vrot.lane.b32.xlu1 %v688_v6, %s1281_s3  ;;  %706 = vst.msk [vmem:[%s1715_s5 + $0xb0] sm:$0xff] %vm85_vm0, %v690_v16  ;;  %v669_v22 = vmul.f32 %v1511_v4, %v646_v18 }
 0x2f4   :  { %v1203_v24 = vpop.eup %1202  ;;  %705 = vst.msk [vmem:[%s1715_s5 + $0xa0] sm:$0xff] %vm85_vm0, %v689_v20  ;;  %747 = vrot.lane.b32.xlu0 %v689_v20, %s1281_s3  ;;  %v668_v41 = vmul.f32 %v1511_v4, %v645_v21 }
 0x2f5   :  { %v1205_v43 = vpop.eup %1204  ;;  %v692_v5 = vadd.f32 %v1517_v10, %v669_v22  ;;  %v648_v26 = vmul.f32 %v1203_v24, %v1500_v47 }
 0x2f6   :  { %v691_v27 = vadd.f32 %v1517_v10, %v668_v41  ;;  %v647_v7 = vmul.f32 %v1205_v43, %v1502_v49 }
 0x2f7   :  { %749 = vrot.lane.b32.xlu1 %v690_v16, %s1281_s3  ;;  %708 = vst.msk [vmem:[%s1715_s5 + $0xd0] sm:$0xff] %vm85_vm0, %v692_v5  ;;  %v671_v28 = vmul.f32 %v1511_v4, %v648_v26 }
 0x2f8   :  { %751 = vrot.lane.b32.xlu0 %v691_v27, %s1281_s3  ;;  %707 = vst.msk [vmem:[%s1715_s5 + $0xc0] sm:$0xff] %vm85_vm0, %v691_v27  ;;  %v670_v47 = vmul.f32 %v1511_v4, %v647_v7 }
 0x2f9   :  { %v694_v49 = vadd.f32 %v1517_v10, %v671_v28 }
 0x2fa   :  { %v693_v30 = vadd.f32 %v1517_v10, %v670_v47 }
 0x2fb   :  { %753 = vrot.lane.b32.xlu1 %v692_v5, %s1281_s3  ;;  %710 = vst.msk [vmem:[%s1715_s5 + $0xf0] sm:$0xff] %vm85_vm0, %v694_v49 }
 0x2fc   :  { %755 = vrot.lane.b32.xlu0 %v693_v30, %s1281_s3  ;;  %709 = vst.msk [vmem:[%s1715_s5 + $0xe0] sm:$0xff] %vm85_vm0, %v693_v30 }
 0x2ff   :  { %757 = vrot.lane.b32.xlu1 %v694_v49, %s1281_s3 }
 0x351   :  { %v730_v4 = vpop.permute.xlu0 %729 }
 0x352   :  { %817 = vst.msk [vmem:[%s1715_s5 + $0x18] sm:$0xff] %vm85_vm0, %v730_v4 }
 0x355   :  { %v734_v10 = vpop.permute.xlu1 %733  ;;  %v728_v32 = vpop.permute.xlu0 %727 }
 0x356   :  { %819 = vst.msk [vmem:[%s1715_s5 + $0x38] sm:$0xff] %vm85_vm0, %v734_v10  ;;  %816 = vst.msk [vmem:[%s1715_s5 + $0x8] sm:$0xff] %vm85_vm0, %v728_v32 }
 0x359   :  { %v732_v33 = vpop.permute.xlu1 %731 }
 0x35a   :  { %818 = vst.msk [vmem:[%s1715_s5 + $0x28] sm:$0xff] %vm85_vm0, %v732_v33  ;;  %v736_v11 = vpop.permute.xlu0 %735 }
 0x35b   :  { %820 = vst.msk [vmem:[%s1715_s5 + $0x48] sm:$0xff] %vm85_vm0, %v736_v11 }
 0x35d   :  { %v738_v13 = vpop.permute.xlu1 %737 }
 0x35e   :  { %821 = vst.msk [vmem:[%s1715_s5 + $0x58] sm:$0xff] %vm85_vm0, %v738_v13  ;;  %v740_v34 = vpop.permute.xlu0 %739 }
 0x35f   :  { %822 = vst.msk [vmem:[%s1715_s5 + $0x68] sm:$0xff] %vm85_vm0, %v740_v34 }
 0x361   :  { %v742_v36 = vpop.permute.xlu1 %741 }
 0x362   :  { %823 = vst.msk [vmem:[%s1715_s5 + $0x78] sm:$0xff] %vm85_vm0, %v742_v36  ;;  %v744_v38 = vpop.permute.xlu0 %743 }
 0x363   :  { %824 = vst.msk [vmem:[%s1715_s5 + $0x88] sm:$0xff] %vm85_vm0, %v744_v38 }
 0x365   :  { %v746_v39 = vpop.permute.xlu1 %745 }
 0x366   :  { %825 = vst.msk [vmem:[%s1715_s5 + $0x98] sm:$0xff] %vm85_vm0, %v746_v39  ;;  %v748_v40 = vpop.permute.xlu0 %747 }
 0x367   :  { %826 = vst.msk [vmem:[%s1715_s5 + $0xa8] sm:$0xff] %vm85_vm0, %v748_v40 }
 0x369   :  { %v750_v42 = vpop.permute.xlu1 %749 }
 0x36a   :  { %827 = vst.msk [vmem:[%s1715_s5 + $0xb8] sm:$0xff] %vm85_vm0, %v750_v42  ;;  %v752_v44 = vpop.permute.xlu0 %751 }
 0x36b   :  { %828 = vst.msk [vmem:[%s1715_s5 + $0xc8] sm:$0xff] %vm85_vm0, %v752_v44 }
 0x36d   :  { %v754_v45 = vpop.permute.xlu1 %753 }
 0x36e   :  { %829 = vst.msk [vmem:[%s1715_s5 + $0xd8] sm:$0xff] %vm85_vm0, %v754_v45  ;;  %v756_v46 = vpop.permute.xlu0 %755 }
 0x36f   :  { %830 = vst.msk [vmem:[%s1715_s5 + $0xe8] sm:$0xff] %vm85_vm0, %v756_v46 }
 0x371   :  { %v758_v17 = vpop.permute.xlu1 %757 }
 0x372   :  { %831 = vst.msk [vmem:[%s1715_s5 + $0xf8] sm:$0xff] %vm85_vm0, %v758_v17 }
 0x373   :  { %796 = vsyncpa [#allocation3], 1 }
 0x374   :  { %797 = vsyncpa [#allocation5], 1 }

</bundles_post_ra>
